<compile_context>
chip_gen: v5e
topology: v5e:2x2
jax: 0.10.0
libtpu: 0.0.40
codegen_flags: <defaults>
</compile_context>

<pallas_src>
from functools import partial

import jax
import jax.numpy as jnp
from jax.experimental import pallas as pl
from jax.experimental.pallas import tpu as pltpu


def _round_up(x, m):
    return ((x + m - 1) // m) * m


# --------------------------------------------------------------------------- #
# Kernel
# --------------------------------------------------------------------------- #
def mag_kernel(text_ref, gaze_ref, whv_t_ref, whv_e_ref, wv_ref, vec_ref, out_ref,
               *, beta_shift, ln_eps, d_true):
    text_bf = text_ref[...]                        # (T, Dp) bf16, padded lanes 0
    gaze_bf = gaze_ref[...]                        # (T, De) bf16

    # f32 working copies for all VPU/EUP math (v5e has no bf16 VALU/EUP).
    text = text_bf.astype(jnp.float32)
    gaze = gaze_bf.astype(jnp.float32)

    # ---- MXU matmuls: bf16 operands, f32 accumulation -----------------------
    # weight_v = relu(W_hv @ cat(gaze, text) + b_hv); the concat is avoided by
    # splitting W_hv into its gaze / text halves.
    pre_text = jnp.dot(text_bf, whv_t_ref[...], preferred_element_type=jnp.float32)
    pre_gaze = jnp.dot(gaze_bf, whv_e_ref[...], preferred_element_type=jnp.float32)
    v_raw = jnp.dot(gaze_bf, wv_ref[...], preferred_element_type=jnp.float32)

    vec = vec_ref[...]                             # (4, Dp) f32
    b_hv = vec[0:1, :]
    b_v = vec[1:2, :]
    gamma = vec[2:3, :]
    beta = vec[3:4, :]

    weight_v = jnp.maximum(pre_text + pre_gaze + b_hv, 0.0)
    h_m = weight_v * (v_raw + b_v)                 # padded lanes stay exactly 0

    # ---- gate: alpha = min(beta_shift * ||text|| / ||h_m||, 1) --------------
    em_sq = jnp.sum(text * text, axis=-1, keepdims=True)
    hm_sq = jnp.sum(h_m * h_m, axis=-1, keepdims=True)
    hm_sq = jnp.where(hm_sq == 0.0, 1.0, hm_sq)    # torch: hm_norm == 0 -> 1
    # sqrt * rsqrt (both EUP) instead of sqrt/sqrt/div; drops the torch +1e-6
    # in the denominator (relative error <= 1e-6/||h_m||, far below the bf16
    # tolerance of this kernel).
    thresh = beta_shift * jnp.sqrt(em_sq) * jax.lax.rsqrt(hm_sq)
    alpha = jnp.minimum(thresh, 1.0)
    ave = alpha * h_m

    # zero_entries = (gaze == 0).all(dim=-1)  <=>  max(|gaze|, -1) == 0
    zero_rows = jnp.max(jnp.abs(gaze), axis=-1, keepdims=True) == 0.0
    ave = jnp.where(zero_rows, 0.0, ave)

    # ---- LayerNorm(ave + text) over the *true* hidden dim -------------------
    # Two-pass variance (robust to large activation offsets).  Padded lanes of
    # x are 0, but (x - mean) is not, so mask them before the second pass.
    x = ave + text
    d_pad = x.shape[-1]
    lane_ok = jax.lax.broadcasted_iota(jnp.int32, (1, d_pad), 1) < d_true
    inv_d = 1.0 / float(d_true)
    mean = jnp.sum(x, axis=-1, keepdims=True) * inv_d
    xc = jnp.where(lane_ok, x - mean, 0.0)
    var = jnp.sum(xc * xc, axis=-1, keepdims=True) * inv_d
    normed = xc * jax.lax.rsqrt(var + ln_eps)
    # padded lanes: xc == 0 and beta padded with 0 -> padded output lanes == 0
    out_ref[...] = (normed * gamma + beta).astype(out_ref.dtype)


# --------------------------------------------------------------------------- #
# Parameter preparation (torch layout -> padded / split / bf16 operands)
# --------------------------------------------------------------------------- #
def prepare_params(params, text_dim, eyes_dim, d_pad):
    w_hv, b_hv, w_v, b_v, gamma, beta = params
    # nn.Linear weight is [out, in]; kernel right-multiplies -> store [in, out].
    whv = w_hv.T                                       # (eyes+text, text)
    whv_e, whv_t = whv[:eyes_dim], whv[eyes_dim:]      # (De, Dt), (Dt, Dt)
    wv = w_v.T                                         # (De, Dt)

    pad = d_pad - text_dim
    whv_t_p = jnp.pad(whv_t, ((0, pad), (0, pad))).astype(jnp.bfloat16)
    whv_e_p = jnp.pad(whv_e, ((0, 0), (0, pad))).astype(jnp.bfloat16)
    wv_p = jnp.pad(wv, ((0, 0), (0, pad))).astype(jnp.bfloat16)

    vec = jnp.stack([
        jnp.pad(b_hv, (0, pad)),
        jnp.pad(b_v, (0, pad)),
        jnp.pad(gamma, (0, pad)),
        jnp.pad(beta, (0, pad)),
    ]).astype(jnp.float32)                             # (4, Dp)

    return whv_t_p, whv_e_p, wv_p, vec


# --------------------------------------------------------------------------- #
# Per-generation VMEM budget and tile sizing
# --------------------------------------------------------------------------- #
def _tpu_budget():
    """(vmem_budget_bytes, preferred_tile_rows, min_grid_steps)."""
    try:
        kind = jax.devices()[0].device_kind.lower()
    except Exception:
        kind = ""
    if "v7" in kind:
        # 64 MiB physical VMEM per TensorCore: leave headroom for compiler
        # scratch and keep >= 2 grid steps so both cores get work.
        return 48 * 1024 * 1024, 512, 2
    # v5e / v6e: 128 MiB physical VMEM, single TensorCore.
    return 96 * 1024 * 1024, 1024, 1


def _choose_tile(n_rows, d_pad, d_e, out_bytes, budget, pref_tile, min_steps,
                 weight_bytes):
    """Largest bf16-friendly (multiple-of-16) row tile that fits the budget."""
    d_e_lanes = max(d_e, 128)
    per_row = (2 * d_pad * 2            # text tiles, bf16, double-buffered
               + 2 * d_e_lanes * 2      # gaze tiles, bf16, double-buffered
               + 2 * d_pad * out_bytes  # output tiles, double-buffered
               + 8 * d_pad * 4)         # in-kernel f32 temporaries / spill slack
    avail = budget - weight_bytes - 4 * 1024 * 1024   # compiler-scratch margin
    max_tile = max(16, (avail // per_row) // 16 * 16)
    tile = min(pref_tile, max_tile, _round_up(max(n_rows, 1), 16))
    if min_steps > 1 and n_rows >= 2 * 16:
        # ensure at least `min_steps` grid steps (v7x megacore) when possible
        per_step = _round_up(-(-n_rows // min_steps), 16)
        tile = min(tile, max(16, per_step))
    return max(16, (tile // 16) * 16)


# --------------------------------------------------------------------------- #
# Wrapper
# --------------------------------------------------------------------------- #
def mag_forward(text, gaze, params, *, beta_shift, ln_eps=1e-5,
                tile_rows=None, out_dtype=jnp.float32):
    """text: [B, S, D_t], gaze: [B, S, D_e] -> [B, S, D_t] (out_dtype)."""
    B, S, D_t = text.shape
    D_e = gaze.shape[-1]
    N = B * S

    d_pad = _round_up(D_t, 128)                    # lane-dense hidden dim
    out_bytes = jax.dtypes.canonicalize_dtype(out_dtype).itemsize

    whv_t, whv_e, wv, vec = prepare_params(params, D_t, D_e, d_pad)
    # TODO(synk): for d_pad >= ~2048 on v7x, the fully resident (d_pad, d_pad)
    # W_hv text half should get its own output-column / K grid axis.
    weight_bytes = d_pad * d_pad * 2 + 2 * D_e * d_pad * 2 + 4 * d_pad * 4

    budget, pref_tile, min_steps = _tpu_budget()
    if tile_rows is not None:
        pref_tile = int(tile_rows)
    tile = _choose_tile(N, d_pad, D_e, out_bytes, budget, pref_tile, min_steps,
                        weight_bytes)
    n_pad = _round_up(N, tile)

    # Stream inputs as bf16 (kernel is HBM-bandwidth bound); the cast + pad
    # fuse into one XLA op and are skipped entirely when no padding is needed.
    text2 = text.reshape(N, D_t).astype(jnp.bfloat16)
    gaze2 = gaze.reshape(N, D_e).astype(jnp.bfloat16)
    if n_pad != N or d_pad != D_t:
        text2 = jnp.pad(text2, ((0, n_pad - N), (0, d_pad - D_t)))
    if n_pad != N:
        gaze2 = jnp.pad(gaze2, ((0, n_pad - N), (0, 0)))

    grid = (n_pad // tile,)
    row_t = pl.BlockSpec((tile, d_pad), lambda i: (i, 0))
    row_e = pl.BlockSpec((tile, D_e), lambda i: (i, 0))

    def _build(single_buffer_consts):
        def const_spec(shape):
            # Grid-invariant operands: single-buffer to halve their VMEM use.
            if single_buffer_consts:
                return pl.BlockSpec(shape, lambda i: (0, 0),
                                    pipeline_mode=pl.Buffered(1))
            return pl.BlockSpec(shape, lambda i: (0, 0))

        return pl.pallas_call(
            partial(mag_kernel, beta_shift=float(beta_shift),
                    ln_eps=float(ln_eps), d_true=int(D_t)),
            out_shape=jax.ShapeDtypeStruct((n_pad, d_pad), out_dtype),
            grid_spec=pltpu.PrefetchScalarGridSpec(
                num_scalar_prefetch=0,
                grid=grid,
                in_specs=[
                    row_t,                           # text rows (bf16, padded 0)
                    row_e,                           # gaze rows (bf16)
                    const_spec((d_pad, d_pad)),      # W_hv text half (bf16)
                    const_spec((D_e, d_pad)),        # W_hv gaze half (bf16)
                    const_spec((D_e, d_pad)),        # W_v (bf16)
                    const_spec((4, d_pad)),          # [b_hv; b_v; gamma; beta]
                ],
                out_specs=pl.BlockSpec((tile, d_pad), lambda i: (i, 0)),
            ),
            compiler_params=pltpu.CompilerParams(
                dimension_semantics=("parallel",),
                vmem_limit_bytes=int(budget)),
        )

    try:
        out = _build(True)(text2, gaze2, whv_t, whv_e, wv, vec)
    except Exception:
        # jax version without BlockSpec.pipeline_mode / Buffered(1): fall back
        # to default double-buffering of the grid-invariant weights.
        out = _build(False)(text2, gaze2, whv_t, whv_e, wv, vec)

    if n_pad == N and d_pad == D_t:
        return out.reshape(B, S, D_t)              # no extra HBM slice pass
    return out[:N, :D_t].reshape(B, S, D_t)


# --------------------------------------------------------------------------- #
# Deterministic synthetic parameters matching the nn.Module shapes
# --------------------------------------------------------------------------- #
def init_params(key, text_dim, eyes_dim):
    k1, k2, k3, k4 = jax.random.split(key, 4)
    cat_dim = eyes_dim + text_dim
    # nn.Linear(eyes_dim + text_dim, text_dim): weight [out=text_dim, in=cat_dim]
    w_hv = jax.random.normal(k1, (text_dim, cat_dim), jnp.float32) * 0.05
    b_hv = jax.random.normal(k2, (text_dim,), jnp.float32) * 0.05
    # nn.Linear(eyes_dim, text_dim)
    w_v = jax.random.normal(k3, (text_dim, eyes_dim), jnp.float32) * 0.05
    b_v = jax.random.normal(k4, (text_dim,), jnp.float32) * 0.05
    # LayerNorm(hidden_size == text_dim)
    gamma = jnp.ones((text_dim,), jnp.float32)
    beta = jnp.zeros((text_dim,), jnp.float32)
    return (w_hv, b_hv, w_v, b_v, gamma, beta)


if __name__ == "__main__":
    B, S = 2, 8
    text_dim = 32          # == hidden_size
    eyes_dim = 16
    beta_shift = 0.5

    key = jax.random.PRNGKey(0)
    k_text, k_gaze, k_params = jax.random.split(key, 3)

    text = jax.random.normal(k_text, (B, S, text_dim), jnp.float32)
    gaze = jax.random.normal(k_gaze, (B, S, eyes_dim), jnp.float32)
    # make a couple of gaze rows all-zero to exercise the zero_entries masking
    gaze = gaze.at[0, 1].set(0.0)
    gaze = gaze.at[1, 3].set(0.0)

    params = init_params(k_params, text_dim, eyes_dim)

    out = mag_forward(text, gaze, params, beta_shift=beta_shift)
    jax.block_until_ready(out)

    # ---- plain-JAX f32 reference (kernel streams bf16 -> loosened tolerance) --
    w_hv, b_hv, w_v, b_v, gamma, beta = params
    t2 = text.reshape(-1, text_dim)
    g2 = gaze.reshape(-1, eyes_dim)
    cat = jnp.concatenate([g2, t2], axis=-1)
    weight_v = jax.nn.relu(cat @ w_hv.T + b_hv)
    h_m = weight_v * (g2 @ w_v.T + b_v)
    em_norm = jnp.linalg.norm(t2, axis=-1)
    hm_norm = jnp.linalg.norm(h_m, axis=-1)
    hm_norm = jnp.where(hm_norm == 0, 1.0, hm_norm)
    alpha = jnp.minimum(em_norm / (hm_norm + 1e-6) * beta_shift, 1.0)[:, None]
    ave = alpha * h_m
    ave = jnp.where(jnp.all(g2 == 0, axis=-1, keepdims=True), 0.0, ave)
    x = ave + t2
    mu = x.mean(-1, keepdims=True)
    var = ((x - mu) ** 2).mean(-1, keepdims=True)
    ref = ((x - mu) / jnp.sqrt(var + 1e-5)) * gamma + beta

    err = float(jnp.max(jnp.abs(out.reshape(-1, text_dim) - ref)))
    assert jnp.allclose(out.reshape(-1, text_dim), ref, atol=2e-2, rtol=2e-2), err

    # exercise the low-writeback bf16 output path as well
    out_bf16 = mag_forward(text, gaze, params, beta_shift=beta_shift,
                           out_dtype=jnp.bfloat16)
    jax.block_until_ready(out_bf16)
    assert jnp.allclose(out_bf16.astype(jnp.float32).reshape(-1, text_dim), ref,
                        atol=5e-2, rtol=5e-2)

    print("KERNEL_OK")
</pallas_src>

<mosaic_0001>
module attributes {stable_mosaic.version = 11 : i64} {
  func.func @mag_kernel(%arg0: i32, %arg1: memref<16x128xbf16, #tpu.memory_space<vmem>>, %arg2: memref<16x16xbf16, #tpu.memory_space<vmem>>, %arg3: memref<128x128xbf16, #tpu.memory_space<vmem>>, %arg4: memref<16x128xbf16, #tpu.memory_space<vmem>>, %arg5: memref<16x128xbf16, #tpu.memory_space<vmem>>, %arg6: memref<4x128xf32, #tpu.memory_space<vmem>>, %arg7: memref<16x128xf32, #tpu.memory_space<vmem>>) attributes {dimension_semantics = [#tpu.dimension_semantics<parallel>], iteration_bounds = array<i64: 1>, scalar_prefetch = 0 : i64, scratch_operands = 0 : i64, tpu.core_type = #tpu.core_type<tc>, window_params = [{transform_indices = @transform_0, window_bounds = array<i64: 16, 128>}, {transform_indices = @transform_1, window_bounds = array<i64: 16, 16>}, {pipeline_mode = #tpu.pipeline_mode<synchronous>, transform_indices = @transform_2, window_bounds = array<i64: 128, 128>}, {pipeline_mode = #tpu.pipeline_mode<synchronous>, transform_indices = @transform_3, window_bounds = array<i64: 16, 128>}, {pipeline_mode = #tpu.pipeline_mode<synchronous>, transform_indices = @transform_4, window_bounds = array<i64: 16, 128>}, {pipeline_mode = #tpu.pipeline_mode<synchronous>, transform_indices = @transform_5, window_bounds = array<i64: 4, 128>}, {transform_indices = @transform_6, window_bounds = array<i64: 16, 128>}]} {
    %c0 = arith.constant 0 : index
    %c0_0 = arith.constant 0 : index
    %0 = vector.load %arg1[%c0, %c0_0] : memref<16x128xbf16, #tpu.memory_space<vmem>>, vector<16x128xbf16>
    %c0_1 = arith.constant 0 : index
    %c0_2 = arith.constant 0 : index
    %1 = vector.load %arg2[%c0_1, %c0_2] : memref<16x16xbf16, #tpu.memory_space<vmem>>, vector<16x16xbf16>
    %2 = arith.extf %0 : vector<16x128xbf16> to vector<16x128xf32>
    %3 = arith.extf %1 : vector<16x16xbf16> to vector<16x16xf32>
    %c0_3 = arith.constant 0 : index
    %c0_4 = arith.constant 0 : index
    %4 = vector.load %arg3[%c0_3, %c0_4] : memref<128x128xbf16, #tpu.memory_space<vmem>>, vector<128x128xbf16>
    %cst = arith.constant dense<0.000000e+00> : vector<16x128xf32>
    %5 = tpu.matmul %0, %4, %cst {dimension_numbers = #tpu.dot_dimension_numbers<[1], [0], [0], [1], [0, 0, 1, 1], [], []>} : vector<16x128xbf16>, vector<128x128xbf16>, vector<16x128xf32> -> vector<16x128xf32>
    %c0_5 = arith.constant 0 : index
    %c0_6 = arith.constant 0 : index
    %6 = vector.load %arg4[%c0_5, %c0_6] : memref<16x128xbf16, #tpu.memory_space<vmem>>, vector<16x128xbf16>
    %cst_7 = arith.constant dense<0.000000e+00> : vector<16x128xf32>
    %7 = tpu.matmul %1, %6, %cst_7 {dimension_numbers = #tpu.dot_dimension_numbers<[1], [0], [0], [1], [0, 0, 1, 1], [], []>} : vector<16x16xbf16>, vector<16x128xbf16>, vector<16x128xf32> -> vector<16x128xf32>
    %c0_8 = arith.constant 0 : index
    %c0_9 = arith.constant 0 : index
    %8 = vector.load %arg5[%c0_8, %c0_9] : memref<16x128xbf16, #tpu.memory_space<vmem>>, vector<16x128xbf16>
    %cst_10 = arith.constant dense<0.000000e+00> : vector<16x128xf32>
    %9 = tpu.matmul %1, %8, %cst_10 {dimension_numbers = #tpu.dot_dimension_numbers<[1], [0], [0], [1], [0, 0, 1, 1], [], []>} : vector<16x16xbf16>, vector<16x128xbf16>, vector<16x128xf32> -> vector<16x128xf32>
    %c0_11 = arith.constant 0 : index
    %c0_12 = arith.constant 0 : index
    %10 = vector.load %arg6[%c0_11, %c0_12] : memref<4x128xf32, #tpu.memory_space<vmem>>, vector<4x128xf32>
    %11 = vector.extract_strided_slice %10 {offsets = [0, 0], sizes = [1, 128], strides = [1, 1]} : vector<4x128xf32> to vector<1x128xf32>
    %12 = vector.extract_strided_slice %10 {offsets = [1, 0], sizes = [1, 128], strides = [1, 1]} : vector<4x128xf32> to vector<1x128xf32>
    %13 = vector.extract_strided_slice %10 {offsets = [2, 0], sizes = [1, 128], strides = [1, 1]} : vector<4x128xf32> to vector<1x128xf32>
    %14 = vector.extract_strided_slice %10 {offsets = [3, 0], sizes = [1, 128], strides = [1, 1]} : vector<4x128xf32> to vector<1x128xf32>
    %15 = arith.addf %5, %7 : vector<16x128xf32>
    %16 = vector.broadcast %11 : vector<1x128xf32> to vector<16x128xf32>
    %17 = arith.addf %15, %16 : vector<16x128xf32>
    %cst_13 = arith.constant 0.000000e+00 : f32
    %18 = vector.broadcast %cst_13 : f32 to vector<16x128xf32>
    %19 = arith.maximumf %17, %18 : vector<16x128xf32>
    %20 = vector.broadcast %12 : vector<1x128xf32> to vector<16x128xf32>
    %21 = arith.addf %9, %20 : vector<16x128xf32>
    %22 = arith.mulf %19, %21 : vector<16x128xf32>
    %23 = arith.mulf %2, %2 : vector<16x128xf32>
    %cst_14 = arith.constant dense<0.000000e+00> : vector<16xf32>
    %24 = vector.multi_reduction <add>, %23, %cst_14 [1] : vector<16x128xf32> to vector<16xf32>
    %25 = vector.shape_cast %24 : vector<16xf32> to vector<16x1xf32>
    %26 = arith.mulf %22, %22 : vector<16x128xf32>
    %cst_15 = arith.constant dense<0.000000e+00> : vector<16xf32>
    %27 = vector.multi_reduction <add>, %26, %cst_15 [1] : vector<16x128xf32> to vector<16xf32>
    %28 = vector.shape_cast %27 : vector<16xf32> to vector<16x1xf32>
    %cst_16 = arith.constant 0.000000e+00 : f32
    %29 = vector.broadcast %cst_16 : f32 to vector<16x1xf32>
    %30 = arith.cmpf oeq, %28, %29 : vector<16x1xf32>
    %cst_17 = arith.constant 1.000000e+00 : f32
    %31 = vector.broadcast %cst_17 : f32 to vector<16x1xf32>
    %32 = arith.select %30, %31, %28 : vector<16x1xi1>, vector<16x1xf32>
    %33 = math.sqrt %25 : vector<16x1xf32>
    %cst_18 = arith.constant 5.000000e-01 : f32
    %34 = vector.broadcast %cst_18 : f32 to vector<16x1xf32>
    %35 = arith.mulf %34, %33 : vector<16x1xf32>
    %36 = math.rsqrt %32 : vector<16x1xf32>
    %37 = arith.mulf %35, %36 : vector<16x1xf32>
    %cst_19 = arith.constant 1.000000e+00 : f32
    %38 = vector.broadcast %cst_19 : f32 to vector<16x1xf32>
    %39 = arith.minimumf %37, %38 : vector<16x1xf32>
    %40 = vector.broadcast %39 : vector<16x1xf32> to vector<16x128xf32>
    %41 = arith.mulf %40, %22 : vector<16x128xf32>
    %42 = math.absf %3 : vector<16x16xf32>
    %cst_20 = arith.constant dense<0xFF800000> : vector<16xf32>
    %43 = vector.multi_reduction <maximumf>, %42, %cst_20 [1] : vector<16x16xf32> to vector<16xf32>
    %44 = vector.shape_cast %43 : vector<16xf32> to vector<16x1xf32>
    %cst_21 = arith.constant 0.000000e+00 : f32
    %45 = vector.broadcast %cst_21 : f32 to vector<16x1xf32>
    %46 = arith.cmpf oeq, %44, %45 : vector<16x1xf32>
    %cst_22 = arith.constant 0.000000e+00 : f32
    %47 = vector.shape_cast %46 : vector<16x1xi1> to vector<16x1xi1>
    %48 = vector.broadcast %47 : vector<16x1xi1> to vector<16x128xi1>
    %49 = vector.broadcast %cst_22 : f32 to vector<16x128xf32>
    %50 = arith.select %48, %49, %41 : vector<16x128xi1>, vector<16x128xf32>
    %51 = arith.addf %50, %2 : vector<16x128xf32>
    %52 = tpu.iota {dimensions = array<i32: 1>} : vector<1x128xi32>
    %c32_i32 = arith.constant 32 : i32
    %53 = vector.broadcast %c32_i32 : i32 to vector<1x128xi32>
    %54 = arith.cmpi slt, %52, %53 : vector<1x128xi32>
    %cst_23 = arith.constant dense<0.000000e+00> : vector<16xf32>
    %55 = vector.multi_reduction <add>, %51, %cst_23 [1] : vector<16x128xf32> to vector<16xf32>
    %56 = vector.shape_cast %55 : vector<16xf32> to vector<16x1xf32>
    %cst_24 = arith.constant 3.125000e-02 : f32
    %57 = vector.broadcast %cst_24 : f32 to vector<16x1xf32>
    %58 = arith.mulf %56, %57 : vector<16x1xf32>
    %59 = vector.broadcast %58 : vector<16x1xf32> to vector<16x128xf32>
    %60 = arith.subf %51, %59 : vector<16x128xf32>
    %cst_25 = arith.constant 0.000000e+00 : f32
    %61 = vector.shape_cast %54 : vector<1x128xi1> to vector<1x128xi1>
    %62 = vector.broadcast %61 : vector<1x128xi1> to vector<16x128xi1>
    %63 = vector.broadcast %cst_25 : f32 to vector<16x128xf32>
    %64 = arith.select %62, %60, %63 : vector<16x128xi1>, vector<16x128xf32>
    %65 = arith.mulf %64, %64 : vector<16x128xf32>
    %cst_26 = arith.constant dense<0.000000e+00> : vector<16xf32>
    %66 = vector.multi_reduction <add>, %65, %cst_26 [1] : vector<16x128xf32> to vector<16xf32>
    %67 = vector.shape_cast %66 : vector<16xf32> to vector<16x1xf32>
    %cst_27 = arith.constant 3.125000e-02 : f32
    %68 = vector.broadcast %cst_27 : f32 to vector<16x1xf32>
    %69 = arith.mulf %67, %68 : vector<16x1xf32>
    %cst_28 = arith.constant 9.99999974E-6 : f32
    %70 = vector.broadcast %cst_28 : f32 to vector<16x1xf32>
    %71 = arith.addf %69, %70 : vector<16x1xf32>
    %72 = math.rsqrt %71 : vector<16x1xf32>
    %73 = vector.broadcast %72 : vector<16x1xf32> to vector<16x128xf32>
    %74 = arith.mulf %64, %73 : vector<16x128xf32>
    %75 = vector.broadcast %13 : vector<1x128xf32> to vector<16x128xf32>
    %76 = arith.mulf %74, %75 : vector<16x128xf32>
    %77 = vector.broadcast %14 : vector<1x128xf32> to vector<16x128xf32>
    %78 = arith.addf %76, %77 : vector<16x128xf32>
    %c0_29 = arith.constant 0 : index
    %c0_30 = arith.constant 0 : index
    %79 = vector.load %arg7[%c0_29, %c0_30] : memref<16x128xf32, #tpu.memory_space<vmem>>, vector<16x128xf32>
    tpu.vector_store %arg7[%c0_29, %c0_30], %78 {strides = array<i32>} : memref<16x128xf32, #tpu.memory_space<vmem>>, vector<16x128xf32>,
    return
  }
  func.func @transform_0(%arg0: i32) -> (i32, i32) {
    %c0_i32 = arith.constant 0 : i32
    %c0_i32_0 = arith.constant 0 : i32
    return %arg0, %c0_i32 : i32, i32
  }
  func.func @transform_1(%arg0: i32) -> (i32, i32) {
    %c0_i32 = arith.constant 0 : i32
    %c0_i32_0 = arith.constant 0 : i32
    return %arg0, %c0_i32 : i32, i32
  }
  func.func @transform_2(%arg0: i32) -> (i32, i32) {
    %c0_i32 = arith.constant 0 : i32
    %c0_i32_0 = arith.constant 0 : i32
    %c0_i32_1 = arith.constant 0 : i32
    return %c0_i32, %c0_i32_0 : i32, i32
  }
  func.func @transform_3(%arg0: i32) -> (i32, i32) {
    %c0_i32 = arith.constant 0 : i32
    %c0_i32_0 = arith.constant 0 : i32
    %c0_i32_1 = arith.constant 0 : i32
    return %c0_i32, %c0_i32_0 : i32, i32
  }
  func.func @transform_4(%arg0: i32) -> (i32, i32) {
    %c0_i32 = arith.constant 0 : i32
    %c0_i32_0 = arith.constant 0 : i32
    %c0_i32_1 = arith.constant 0 : i32
    return %c0_i32, %c0_i32_0 : i32, i32
  }
  func.func @transform_5(%arg0: i32) -> (i32, i32) {
    %c0_i32 = arith.constant 0 : i32
    %c0_i32_0 = arith.constant 0 : i32
    %c0_i32_1 = arith.constant 0 : i32
    return %c0_i32, %c0_i32_0 : i32, i32
  }
  func.func @transform_6(%arg0: i32) -> (i32, i32) {
    %c0_i32 = arith.constant 0 : i32
    %c0_i32_0 = arith.constant 0 : i32
    return %arg0, %c0_i32 : i32, i32
  }
}

module attributes {stable_mosaic.version = 11 : i64} {
  func.func @mag_kernel(%arg0: i32, %arg1: memref<16x128xbf16, #tpu.memory_space<vmem>>, %arg2: memref<16x16xbf16, #tpu.memory_space<vmem>>, %arg3: memref<128x128xbf16, #tpu.memory_space<vmem>>, %arg4: memref<16x128xbf16, #tpu.memory_space<vmem>>, %arg5: memref<16x128xbf16, #tpu.memory_space<vmem>>, %arg6: memref<4x128xf32, #tpu.memory_space<vmem>>, %arg7: memref<16x128xf32, #tpu.memory_space<vmem>>) attributes {dimension_semantics = [#tpu.dimension_semantics<parallel>], iteration_bounds = array<i64: 1>, scalar_prefetch = 0 : i64, scratch_operands = 0 : i64, tpu.core_type = #tpu.core_type<tc>, window_params = [{transform_indices = @transform_0, window_bounds = array<i64: 16, 128>}, {transform_indices = @transform_1, window_bounds = array<i64: 16, 16>}, {pipeline_mode = #tpu.pipeline_mode<synchronous>, transform_indices = @transform_2, window_bounds = array<i64: 128, 128>}, {pipeline_mode = #tpu.pipeline_mode<synchronous>, transform_indices = @transform_3, window_bounds = array<i64: 16, 128>}, {pipeline_mode = #tpu.pipeline_mode<synchronous>, transform_indices = @transform_4, window_bounds = array<i64: 16, 128>}, {pipeline_mode = #tpu.pipeline_mode<synchronous>, transform_indices = @transform_5, window_bounds = array<i64: 4, 128>}, {transform_indices = @transform_6, window_bounds = array<i64: 16, 128>}]} {
    %c0 = arith.constant 0 : index
    %c0_0 = arith.constant 0 : index
    %0 = vector.load %arg1[%c0, %c0_0] : memref<16x128xbf16, #tpu.memory_space<vmem>>, vector<16x128xbf16>
    %c0_1 = arith.constant 0 : index
    %c0_2 = arith.constant 0 : index
    %1 = vector.load %arg2[%c0_1, %c0_2] : memref<16x16xbf16, #tpu.memory_space<vmem>>, vector<16x16xbf16>
    %2 = arith.extf %0 : vector<16x128xbf16> to vector<16x128xf32>
    %3 = arith.extf %1 : vector<16x16xbf16> to vector<16x16xf32>
    %c0_3 = arith.constant 0 : index
    %c0_4 = arith.constant 0 : index
    %4 = vector.load %arg3[%c0_3, %c0_4] : memref<128x128xbf16, #tpu.memory_space<vmem>>, vector<128x128xbf16>
    %cst = arith.constant dense<0.000000e+00> : vector<16x128xf32>
    %5 = tpu.matmul %0, %4, %cst {dimension_numbers = #tpu.dot_dimension_numbers<[1], [0], [0], [1], [0, 0, 1, 1], [], []>} : vector<16x128xbf16>, vector<128x128xbf16>, vector<16x128xf32> -> vector<16x128xf32>
    %c0_5 = arith.constant 0 : index
    %c0_6 = arith.constant 0 : index
    %6 = vector.load %arg4[%c0_5, %c0_6] : memref<16x128xbf16, #tpu.memory_space<vmem>>, vector<16x128xbf16>
    %cst_7 = arith.constant dense<0.000000e+00> : vector<16x128xf32>
    %7 = tpu.matmul %1, %6, %cst_7 {dimension_numbers = #tpu.dot_dimension_numbers<[1], [0], [0], [1], [0, 0, 1, 1], [], []>} : vector<16x16xbf16>, vector<16x128xbf16>, vector<16x128xf32> -> vector<16x128xf32>
    %c0_8 = arith.constant 0 : index
    %c0_9 = arith.constant 0 : index
    %8 = vector.load %arg5[%c0_8, %c0_9] : memref<16x128xbf16, #tpu.memory_space<vmem>>, vector<16x128xbf16>
    %cst_10 = arith.constant dense<0.000000e+00> : vector<16x128xf32>
    %9 = tpu.matmul %1, %8, %cst_10 {dimension_numbers = #tpu.dot_dimension_numbers<[1], [0], [0], [1], [0, 0, 1, 1], [], []>} : vector<16x16xbf16>, vector<16x128xbf16>, vector<16x128xf32> -> vector<16x128xf32>
    %c0_11 = arith.constant 0 : index
    %c0_12 = arith.constant 0 : index
    %10 = vector.load %arg6[%c0_11, %c0_12] : memref<4x128xf32, #tpu.memory_space<vmem>>, vector<4x128xf32>
    %11 = vector.extract_strided_slice %10 {offsets = [0, 0], sizes = [1, 128], strides = [1, 1]} : vector<4x128xf32> to vector<1x128xf32>
    %12 = vector.extract_strided_slice %10 {offsets = [1, 0], sizes = [1, 128], strides = [1, 1]} : vector<4x128xf32> to vector<1x128xf32>
    %13 = vector.extract_strided_slice %10 {offsets = [2, 0], sizes = [1, 128], strides = [1, 1]} : vector<4x128xf32> to vector<1x128xf32>
    %14 = vector.extract_strided_slice %10 {offsets = [3, 0], sizes = [1, 128], strides = [1, 1]} : vector<4x128xf32> to vector<1x128xf32>
    %15 = arith.addf %5, %7 : vector<16x128xf32>
    %16 = vector.broadcast %11 : vector<1x128xf32> to vector<16x128xf32>
    %17 = arith.addf %15, %16 : vector<16x128xf32>
    %cst_13 = arith.constant 0.000000e+00 : f32
    %18 = vector.broadcast %cst_13 : f32 to vector<16x128xf32>
    %19 = arith.maximumf %17, %18 : vector<16x128xf32>
    %20 = vector.broadcast %12 : vector<1x128xf32> to vector<16x128xf32>
    %21 = arith.addf %9, %20 : vector<16x128xf32>
    %22 = arith.mulf %19, %21 : vector<16x128xf32>
    %23 = arith.mulf %2, %2 : vector<16x128xf32>
    %cst_14 = arith.constant dense<0.000000e+00> : vector<16xf32>
    %24 = vector.multi_reduction <add>, %23, %cst_14 [1] : vector<16x128xf32> to vector<16xf32>
    %25 = vector.shape_cast %24 : vector<16xf32> to vector<16x1xf32>
    %26 = arith.mulf %22, %22 : vector<16x128xf32>
    %cst_15 = arith.constant dense<0.000000e+00> : vector<16xf32>
    %27 = vector.multi_reduction <add>, %26, %cst_15 [1] : vector<16x128xf32> to vector<16xf32>
    %28 = vector.shape_cast %27 : vector<16xf32> to vector<16x1xf32>
    %cst_16 = arith.constant 0.000000e+00 : f32
    %29 = vector.broadcast %cst_16 : f32 to vector<16x1xf32>
    %30 = arith.cmpf oeq, %28, %29 : vector<16x1xf32>
    %cst_17 = arith.constant 1.000000e+00 : f32
    %31 = vector.broadcast %cst_17 : f32 to vector<16x1xf32>
    %32 = arith.select %30, %31, %28 : vector<16x1xi1>, vector<16x1xf32>
    %33 = math.sqrt %25 : vector<16x1xf32>
    %cst_18 = arith.constant 5.000000e-01 : f32
    %34 = vector.broadcast %cst_18 : f32 to vector<16x1xf32>
    %35 = arith.mulf %34, %33 : vector<16x1xf32>
    %36 = math.rsqrt %32 : vector<16x1xf32>
    %37 = arith.mulf %35, %36 : vector<16x1xf32>
    %cst_19 = arith.constant 1.000000e+00 : f32
    %38 = vector.broadcast %cst_19 : f32 to vector<16x1xf32>
    %39 = arith.minimumf %37, %38 : vector<16x1xf32>
    %40 = vector.broadcast %39 : vector<16x1xf32> to vector<16x128xf32>
    %41 = arith.mulf %40, %22 : vector<16x128xf32>
    %42 = math.absf %3 : vector<16x16xf32>
    %cst_20 = arith.constant dense<0xFF800000> : vector<16xf32>
    %43 = vector.multi_reduction <maximumf>, %42, %cst_20 [1] : vector<16x16xf32> to vector<16xf32>
    %44 = vector.shape_cast %43 : vector<16xf32> to vector<16x1xf32>
    %cst_21 = arith.constant 0.000000e+00 : f32
    %45 = vector.broadcast %cst_21 : f32 to vector<16x1xf32>
    %46 = arith.cmpf oeq, %44, %45 : vector<16x1xf32>
    %cst_22 = arith.constant 0.000000e+00 : f32
    %47 = vector.shape_cast %46 : vector<16x1xi1> to vector<16x1xi1>
    %48 = vector.broadcast %47 : vector<16x1xi1> to vector<16x128xi1>
    %49 = vector.broadcast %cst_22 : f32 to vector<16x128xf32>
    %50 = arith.select %48, %49, %41 : vector<16x128xi1>, vector<16x128xf32>
    %51 = arith.addf %50, %2 : vector<16x128xf32>
    %52 = tpu.iota {dimensions = array<i32: 1>} : vector<1x128xi32>
    %c32_i32 = arith.constant 32 : i32
    %53 = vector.broadcast %c32_i32 : i32 to vector<1x128xi32>
    %54 = arith.cmpi slt, %52, %53 : vector<1x128xi32>
    %cst_23 = arith.constant dense<0.000000e+00> : vector<16xf32>
    %55 = vector.multi_reduction <add>, %51, %cst_23 [1] : vector<16x128xf32> to vector<16xf32>
    %56 = vector.shape_cast %55 : vector<16xf32> to vector<16x1xf32>
    %cst_24 = arith.constant 3.125000e-02 : f32
    %57 = vector.broadcast %cst_24 : f32 to vector<16x1xf32>
    %58 = arith.mulf %56, %57 : vector<16x1xf32>
    %59 = vector.broadcast %58 : vector<16x1xf32> to vector<16x128xf32>
    %60 = arith.subf %51, %59 : vector<16x128xf32>
    %cst_25 = arith.constant 0.000000e+00 : f32
    %61 = vector.shape_cast %54 : vector<1x128xi1> to vector<1x128xi1>
    %62 = vector.broadcast %61 : vector<1x128xi1> to vector<16x128xi1>
    %63 = vector.broadcast %cst_25 : f32 to vector<16x128xf32>
    %64 = arith.select %62, %60, %63 : vector<16x128xi1>, vector<16x128xf32>
    %65 = arith.mulf %64, %64 : vector<16x128xf32>
    %cst_26 = arith.constant dense<0.000000e+00> : vector<16xf32>
    %66 = vector.multi_reduction <add>, %65, %cst_26 [1] : vector<16x128xf32> to vector<16xf32>
    %67 = vector.shape_cast %66 : vector<16xf32> to vector<16x1xf32>
    %cst_27 = arith.constant 3.125000e-02 : f32
    %68 = vector.broadcast %cst_27 : f32 to vector<16x1xf32>
    %69 = arith.mulf %67, %68 : vector<16x1xf32>
    %cst_28 = arith.constant 9.99999974E-6 : f32
    %70 = vector.broadcast %cst_28 : f32 to vector<16x1xf32>
    %71 = arith.addf %69, %70 : vector<16x1xf32>
    %72 = math.rsqrt %71 : vector<16x1xf32>
    %73 = vector.broadcast %72 : vector<16x1xf32> to vector<16x128xf32>
    %74 = arith.mulf %64, %73 : vector<16x128xf32>
    %75 = vector.broadcast %13 : vector<1x128xf32> to vector<16x128xf32>
    %76 = arith.mulf %74, %75 : vector<16x128xf32>
    %77 = vector.broadcast %14 : vector<1x128xf32> to vector<16x128xf32>
    %78 = arith.addf %76, %77 : vector<16x128xf32>
    %c0_29 = arith.constant 0 : index
    %c0_30 = arith.constant 0 : index
    %79 = vector.load %arg7[%c0_29, %c0_30] : memref<16x128xf32, #tpu.memory_space<vmem>>, vector<16x128xf32>
    tpu.vector_store %arg7[%c0_29, %c0_30], %78 {strides = array<i32>} : memref<16x128xf32, #tpu.memory_space<vmem>>, vector<16x128xf32>,
    return
  }
  func.func @transform_0(%arg0: i32) -> (i32, i32) {
    %c0_i32 = arith.constant 0 : i32
    %c0_i32_0 = arith.constant 0 : i32
    return %arg0, %c0_i32 : i32, i32
  }
  func.func @transform_1(%arg0: i32) -> (i32, i32) {
    %c0_i32 = arith.constant 0 : i32
    %c0_i32_0 = arith.constant 0 : i32
    return %arg0, %c0_i32 : i32, i32
  }
  func.func @transform_2(%arg0: i32) -> (i32, i32) {
    %c0_i32 = arith.constant 0 : i32
    %c0_i32_0 = arith.constant 0 : i32
    %c0_i32_1 = arith.constant 0 : i32
    return %c0_i32, %c0_i32_0 : i32, i32
  }
  func.func @transform_3(%arg0: i32) -> (i32, i32) {
    %c0_i32 = arith.constant 0 : i32
    %c0_i32_0 = arith.constant 0 : i32
    %c0_i32_1 = arith.constant 0 : i32
    return %c0_i32, %c0_i32_0 : i32, i32
  }
  func.func @transform_4(%arg0: i32) -> (i32, i32) {
    %c0_i32 = arith.constant 0 : i32
    %c0_i32_0 = arith.constant 0 : i32
    %c0_i32_1 = arith.constant 0 : i32
    return %c0_i32, %c0_i32_0 : i32, i32
  }
  func.func @transform_5(%arg0: i32) -> (i32, i32) {
    %c0_i32 = arith.constant 0 : i32
    %c0_i32_0 = arith.constant 0 : i32
    %c0_i32_1 = arith.constant 0 : i32
    return %c0_i32, %c0_i32_0 : i32, i32
  }
  func.func @transform_6(%arg0: i32) -> (i32, i32) {
    %c0_i32 = arith.constant 0 : i32
    %c0_i32_0 = arith.constant 0 : i32
    return %arg0, %c0_i32 : i32, i32
  }
}

</mosaic_0001>

<bundles_post_ra>
// kernel: tpu_custom_call.1
= control target key start
LH: loop header
LB: loop body
LE: loop exit
PB: predicated region body
PF: predicated region fallthrough
CT: control target
= control target key end

     0   :  { %11 = vsyncpa [#allocation3], 0  ;;  %s751_s0 = inlined_call_operand.hbm [shape: bf16[16,128], index: 0, kind: input, shape index: {}]   ;;  %s752_s1 = inlined_call_operand.hbm [shape: bf16[16,16], index: 1, kind: input, shape index: {}]   ;;  %s753_s2 = inlined_call_operand.hbm [shape: bf16[128,128], index: 2, kind: input, shape index: {}]   ;;  %s754_s3 = inlined_call_operand.hbm [shape: bf16[16,128], index: 3, kind: input, shape index: {}]   ;;  %s755_s4 = inlined_call_operand.hbm [shape: bf16[16,128], index: 4, kind: input, shape index: {}]   ;;  %s756_s5 = inlined_call_operand.vmem [shape: f32[4,128], index: 5, kind: input, shape index: {}]   ;;  %s757_s6 = inlined_call_operand.hbm [shape: f32[16,128], index: 6, kind: output, shape index: {}]  }
   0x1   :  { %12 = vsyncpa [#allocation6], 0 }
   0x2   :  { %13 = vsyncpa [#allocation9], 0 }
   0x3   :  { %14 = vsyncpa [#allocation4], 0  ;;  %s32_s23 = sshll.u32 %s752_s1, 4  ;;  %s655_s24 = smov [#allocation5]   ;;  %s33_s23 = int_to_ptr.hbm [resolvable:$true] %s32_s23 }
   0x4   :  { %s34_s25 = sshll.u32 %s655_s24, 4  ;;  %s58_s28 = sshll.u32 %s754_s3, 4  ;;  %s35_s25 = int_to_ptr.vmem [resolvable:$true] %s34_s25  ;;  %s59_s28 = int_to_ptr.hbm [resolvable:$true] %s58_s28 }
   0x5   :  { %s656_s29 = smov 64   ;;  %s657_s30 = smov 4  }
   0x6   :  { %40 = dma.hbm_to_vmem [thread:$0]  %s33_s23, 128, %s35_s25, [#allocation6], %s656_s29, %s656_s29, %s657_s30  }
   0x7   :  { %s658_s7 = smov [#allocation8]   ;;  %s19_s11 = sshll.u32 %s751_s0, 4  ;;  %s20_s11 = int_to_ptr.hbm [resolvable:$true] %s19_s11 }
   0x8   :  { %s60_s8 = sshll.u32 %s658_s7, 4  ;;  %s45_s13 = sshll.u32 %s753_s2, 4  ;;  %s61_s8 = int_to_ptr.vmem [resolvable:$true] %s60_s8  ;;  %s46_s13 = int_to_ptr.hbm [resolvable:$true] %s45_s13 }
   0x9   :  { %66 = dma.hbm_to_vmem [thread:$0]  %s59_s28, 128, %s61_s8, [#allocation9], %s656_s29, %s656_s29, %s657_s30  }
   0xa   :  { %s659_s14 = smov [#allocation2]   ;;  %s660_s3 = smov [#allocation7]  }
   0xb   :  { %s21_s15 = sshll.u32 %s659_s14, 4  ;;  %s47_s16 = sshll.u32 %s660_s3, 4  ;;  %s22_s15 = int_to_ptr.vmem [resolvable:$true] %s21_s15  ;;  %s48_s16 = int_to_ptr.vmem [resolvable:$true] %s47_s16 }
   0xc   :  { %27 = dma.hbm_to_vmem [thread:$0]  %s20_s11, 128, %s22_s15, [#allocation3], %s656_s29, %s656_s29, %s657_s30  }
   0xd   :  { %s71_s19 = sshll.u32 %s755_s4, 4  ;;  %s661_s0 = smov [#allocation10]   ;;  %s72_s19 = int_to_ptr.hbm [resolvable:$true] %s71_s19 }
   0xe   :  { %53 = dma.hbm_to_vmem [thread:$0]  %s46_s13, 1024, %s48_s16, [#allocation6], %s656_s29, %s656_s29, %s657_s30  }
   0xf   :  { %s73_s20 = sshll.u32 %s661_s0, 4  ;;  %s74_s20 = int_to_ptr.vmem [resolvable:$true] %s73_s20 }
  0x10   :  { %79 = dma.hbm_to_vmem [thread:$0]  %s72_s19, 128, %s74_s20, [#allocation9], %s656_s29, %s656_s29, %s657_s30  }
  0x11   :  { %647 = dma.done.wait [#allocation3], 128  }
  0x12   :  { %648 = vsyncadd [#allocation3], 4294967168 }
  0x13   :  { %649 = dma.done.wait [#allocation6], 1152  }
  0x14   :  { %650 = vsyncadd [#allocation6], 4294966144 }
  0x15   :  { %651 = dma.done.wait [#allocation9], 256  }
  0x16   :  { %652 = vsyncadd [#allocation9], 4294967040  ;;  %v478_v0 = vld [vmem:[#allocation7 + $0x38] sm:$0xff]  ;;  %v480_v1 = vld [vmem:[#allocation10] sm:$0xff]  ;;  %vm140_vm0 = vcmask 130048   ;;  %s404_s24 = sshll.u32 %s757_s6, 4  ;;  %s405_s24 = int_to_ptr.hbm [resolvable:$true] %s404_s24 }
  0x17   :  { %215 = vmatpush.bf16.msra.mxu1 %v478_v0  ;;  %v477_v2 = vld [vmem:[#allocation7 + $0x30] sm:$0xff]  ;;  %v479_v3 = vld [vmem:[#allocation8] sm:$0xff]  ;;  %v470_v4 = vld [vmem:[#allocation5] sm:$0xff]  ;;  %248 = vmatpush.bf16.msra.mxu2 %v480_v1  ;;  %s663_s25 = smov 128   ;;  %s664_s26 = smov 8  }
  0x18   :  { %151 = vmatpush.bf16.msra.mxu0 %v479_v3  ;;  %v103_v5 = vld [vmem:[#allocation2] sm:$0xff]   ;;  %v476_v7 = vld [vmem:[#allocation7 + $0x28] sm:$0xff]  ;;  %v475_v9 = vld [vmem:[#allocation7 + $0x20] sm:$0xff] }
  0x19   :  { %v715_v6 = vunpack.c.l.bf16 %v103_v5  ;;  %v474_v10 = vld [vmem:[#allocation7 + $0x18] sm:$0xff]  ;;  %v473_v11 = vld [vmem:[#allocation7 + $0x10] sm:$0xff]  ;;  %v472_v12 = vld [vmem:[#allocation7 + $0x8] sm:$0xff]  ;;  %v721_v15 = vunpack.c.h.bf16 %v103_v5 }
  0x1a   :  { %468 = vmatmul.msk.bf16.vlgmr.msra.gmra.mxu2 %vm140_vm0, %v470_v4  ;;  %v471_v13 = vld [vmem:[#allocation7] sm:$0xff]  ;;  %v469_v14 = vld [vmem:[#allocation2] sm:$0xff]  ;;  %v105_v17 = vld [vmem:[#allocation5] sm:$0xff]  }
  0x1b   :  { %216 = vmatpush.bf16.msra.mxu1 %v477_v2  ;;  %427 = vmatmul.msk.bf16.vlgmr.msra.gmra.mxu0 %vm140_vm0, %v470_v4  ;;  %v257_v8 = vmul.f32 %v715_v6, %v715_v6  ;;  %v258_v16 = vmul.f32 %v721_v15, %v721_v15  ;;  %v109_v18 = vunpack.c.l.bf16 %v105_v17  ;;  %v110_v20 = vunpack.c.h.bf16 %v105_v17  ;;  %v729_v23 = vld [vmem:[%s756_s5] sm:$0xf]  ;;  %s662_s5 = smov [#allocation11]  }
  0x1c   :  { %v234_v26 = vperm.slane %v729_v23, 1  ;;  %v229_v27 = vperm.slane %v729_v23, 0  ;;  %s402_s21 = sshll.u32 %s662_s5, 4  ;;  %s403_s21 = int_to_ptr.vmem [resolvable:$true] %s402_s21 }
  0x1d   :  { %259 = vadd.xlane.f32.xlu0 %v257_v8  ;;  %v325_v19 = vand.u32 2147483647, %v109_v18  ;;  %v326_v22 = vand.u32 2147483647, %v110_v20 }
  0x1f   :  { %217 = vmatpush.bf16.msra.mxu1 %v476_v7  ;;  %v327_v21 = vsel %vm140_vm0, %v325_v19, -inf  ;;  %v330_v25 = vsel %vm140_vm0, %v326_v22, -inf }
  0x20   :  { %328 = vmax.xlane.f32.xlu2 %v327_v21 }
  0x23   :  { %218 = vmatpush.bf16.msra.mxu1 %v475_v9 }
  0x25   :  { %261 = vadd.xlane.f32.xlu0 %v258_v16 }
  0x27   :  { %219 = vmatpush.bf16.msra.mxu1 %v474_v10 }
  0x28   :  { %331 = vmax.xlane.f32.xlu2 %v330_v25 }
  0x2b   :  { %220 = vmatpush.bf16.msra.mxu1 %v473_v11 }
  0x2f   :  { %221 = vmatpush.bf16.msra.mxu1 %v472_v12 }
  0x33   :  { %222 = vmatpush.bf16.msra.mxu1 %v471_v13 }
  0x36   :  { %223 = vmatmul.bf16.vlgmr.msra.gmra.mxu1 %v469_v14 }
  0x90   :  { %v260_v45 = vpop.xlane.xlu0 %259 }
  0x91   :  { %491 = vrsqrt.f32 %v260_v45  ;;  %vm280_vm3 = vcmp.eq.f32.partialorder %v260_v45, inf  ;;  %v283_v2 = vand.u32 2147483648, %v260_v45  ;;  %vm282_vm4 = vcmp.eq.f32.partialorder %v260_v45, 0.0 }
  0x93   :  { %v329_v13 = vpop.xlane.xlu2 %328 }
  0x94   :  { %vm333_vm11 = vcmp.eq.f32.partialorder %v329_v13, 0.0 }
  0x97   :  { %v492_v47 = vpop.eup %491 }
  0x98   :  { %v153_v24 = vpop.f32.mrf.mxu0  ;;  %v262_v46 = vpop.xlane.xlu0 %261  ;;  %v274_v48 = vmul.f32 %v492_v47, %v260_v45 }
  0x99   :  { %493 = vrsqrt.f32 %v262_v46  ;;  %vm292_vm7 = vcmp.eq.f32.partialorder %v262_v46, inf  ;;  %v295_v18 = vand.u32 2147483648, %v262_v46  ;;  %vm294_vm9 = vcmp.eq.f32.partialorder %v262_v46, 0.0 }
  0x9a   :  { %v275_v49 = vmul.f32 %v492_v47, %v274_v48 }
  0x9c   :  { %v276_v51 = vmul.f32 0.5, %v275_v49 }
  0x9d   :  { %v250_v28 = vpop.f32.mrf.mxu2 }
  0x9e   :  { %v251_v31 = vadd.f32 %v250_v28, %v234_v26  ;;  %v277_v54 = vsub.f32 1.5, %v276_v51 }
  0x9f   :  { %v494_v50 = vpop.eup %493 }
  0xa0   :  { %v155_v35 = vpop.f32.mrf.mxu0  ;;  %v286_v52 = vmul.f32 %v494_v50, %v262_v46  ;;  %v278_v58 = vmul.f32 %v492_v47, %v277_v54 }
  0xa2   :  { %v287_v55 = vmul.f32 %v494_v50, %v286_v52  ;;  %v279_v62 = vmul.f32 %v278_v58, %v260_v45 }
  0xa4   :  { %v288_v57 = vmul.f32 0.5, %v287_v55  ;;  %v281_v3 = vsel %vm280_vm3, %v260_v45, %v279_v62  ;;  %v390_v62 = vperm.slane %v729_v23, 2 }
  0xa5   :  { %v252_v39 = vpop.f32.mrf.mxu2  ;;  %v284_v8 = vsel %vm282_vm4, %v283_v2, %v281_v3 }
  0xa6   :  { %v253_v41 = vadd.f32 %v252_v39, %v234_v26  ;;  %v289_v61 = vsub.f32 1.5, %v288_v57  ;;  %v297_v14 = vmul.f32 0.5, %v284_v8 }
  0xa8   :  { %v290_v4 = vmul.f32 %v494_v50, %v289_v61 }
  0xaa   :  { %v291_v10 = vmul.f32 %v290_v4, %v262_v46 }
  0xac   :  { %v293_v20 = vsel %vm292_vm7, %v262_v46, %v291_v10 }
  0xad   :  { %v296_v25 = vsel %vm294_vm9, %v295_v18, %v293_v20 }
  0xb3   :  { %v224_v29 = vpop.f32.mrf.mxu1 }
  0xb4   :  { %v225_v30 = vadd.f32 %v224_v29, %v153_v24  ;;  %v298_v29 = vmul.f32 0.5, %v296_v25 }
  0xb6   :  { %v230_v32 = vadd.f32 %v229_v27, %v225_v30 }
  0xb8   :  { %v232_v33 = vmax.f32 %v230_v32, 0.0  ;;  %v332_v32 = vpop.xlane.xlu2 %331 }
  0xb9   :  { %vm334_vm14 = vcmp.eq.f32.partialorder %v332_v32, 0.0 }
  0xba   :  { %v734_v34 = vmul.f32 %v251_v31, %v232_v33 }
  0xbb   :  { %v226_v36 = vpop.f32.mrf.mxu1 }
  0xbc   :  { %v227_v37 = vadd.f32 %v226_v36, %v155_v35  ;;  %v263_v38 = vmul.f32 %v734_v34, %v734_v34 }
  0xbe   :  { %v231_v40 = vadd.f32 %v229_v27, %v227_v37  ;;  %265 = vadd.xlane.f32.xlu1 %v263_v38 }
  0xc0   :  { %v233_v42 = vmax.f32 %v231_v40, 0.0 }
  0xc2   :  { %v738_v43 = vmul.f32 %v253_v41, %v233_v42 }
  0xc4   :  { %v264_v44 = vmul.f32 %v738_v43, %v738_v43 }
  0xc6   :  { %267 = vadd.xlane.f32.xlu1 %v264_v44 }
 0x131   :  { %v266_v53 = vpop.xlane.xlu1 %265 }
 0x132   :  { %vm269_vm1 = vcmp.eq.f32.partialorder %v266_v53, 0.0 }
 0x133   :  { %v271_v56 = vsel %vm269_vm1, 1.0, %v266_v53 }
 0x134   :  { %495 = vrsqrt.f32 %v271_v56  ;;  %vm305_vm6 = vweird.f32 %v271_v56 }
 0x139   :  { %v268_v59 = vpop.xlane.xlu1 %267 }
 0x13a   :  { %v496_v60 = vpop.eup %495  ;;  %vm270_vm2 = vcmp.eq.f32.partialorder %v268_v59, 0.0 }
 0x13b   :  { %v300_v63 = vmul.f32 %v496_v60, %v271_v56  ;;  %v272_v0 = vsel %vm270_vm2, 1.0, %v268_v59  ;;  %vm306_vm5 = vweird.f32 %v496_v60 }
 0x13c   :  { %497 = vrsqrt.f32 %v272_v0  ;;  %vm307_vm8 = vmor %vm305_vm6, %vm306_vm5  ;;  %vm315_vm12 = vweird.f32 %v272_v0 }
 0x13d   :  { %v301_v1 = vmul.f32 %v496_v60, %v300_v63 }
 0x13f   :  { %v302_v5 = vmul.f32 0.5, %v301_v1  ;;  %v393_v1 = vperm.slane %v729_v23, 3 }
 0x141   :  { %v303_v7 = vsub.f32 1.5, %v302_v5 }
 0x142   :  { %v498_v9 = vpop.eup %497 }
 0x143   :  { %v304_v11 = vmul.f32 %v496_v60, %v303_v7  ;;  %v310_v12 = vmul.f32 %v498_v9, %v272_v0  ;;  %vm316_vm10 = vweird.f32 %v498_v9 }
 0x144   :  { %vm317_vm13 = vmor %vm315_vm12, %vm316_vm10 }
 0x145   :  { %v311_v16 = vmul.f32 %v498_v9, %v310_v12  ;;  %v308_v17 = vsel %vm307_vm8, %v496_v60, %v304_v11 }
 0x146   :  { %v319_v19 = vmul.f32 %v308_v17, %v297_v14 }
 0x147   :  { %v312_v21 = vmul.f32 0.5, %v311_v16 }
 0x148   :  { %v321_v22 = vmin.f32 %v319_v19, 1.0 }
 0x149   :  { %v313_v24 = vsub.f32 1.5, %v312_v21 }
 0x14a   :  { %v323_v26 = vmul.f32 %v321_v22, %v734_v34  ;;  %v343_v34 = vlaneseq }
 0x14b   :  { %v314_v27 = vmul.f32 %v498_v9, %v313_v24 }
 0x14c   :  { %v339_v28 = vsel %vm333_vm11, 0.0, %v323_v26  ;;  %v344_v39 = vand.u32 127, %v343_v34 }
 0x14d   :  { %v341_v30 = vadd.f32 %v339_v28, %v715_v6  ;;  %v318_v31 = vsel %vm317_vm13, %v498_v9, %v314_v27 }
 0x14e   :  { %v320_v33 = vmul.f32 %v318_v31, %v298_v29  ;;  %vm345_vm15 = vcmp.lt.s32.totalorder %v344_v39, 32 }
 0x14f   :  { %346 = vadd.xlane.f32.xlu0 %v341_v30 }
 0x150   :  { %v322_v35 = vmin.f32 %v320_v33, 1.0 }
 0x152   :  { %v324_v36 = vmul.f32 %v322_v35, %v738_v43 }
 0x154   :  { %v340_v37 = vsel %vm334_vm14, 0.0, %v324_v36 }
 0x155   :  { %v342_v38 = vadd.f32 %v340_v37, %v721_v15 }
 0x157   :  { %348 = vadd.xlane.f32.xlu1 %v342_v38 }
 0x1c2   :  { %v347_v40 = vpop.xlane.xlu0 %346 }
 0x1c3   :  { %v350_v41 = vmul.f32 0.03125, %v347_v40 }
 0x1c5   :  { %v352_v42 = vsub.f32 %v341_v30, %v350_v41 }
 0x1c7   :  { %v356_v44 = vsel %vm345_vm15, %v352_v42, 0.0 }
 0x1c8   :  { %v358_v6 = vmul.f32 %v356_v44, %v356_v44 }
 0x1ca   :  { %v349_v45 = vpop.xlane.xlu1 %348  ;;  %360 = vadd.xlane.f32.xlu2 %v358_v6 }
 0x1cb   :  { %v351_v46 = vmul.f32 0.03125, %v349_v45 }
 0x1cd   :  { %v353_v47 = vsub.f32 %v342_v38, %v351_v46 }
 0x1cf   :  { %v357_v48 = vsel %vm345_vm15, %v353_v47, 0.0 }
 0x1d0   :  { %v359_v49 = vmul.f32 %v357_v48, %v357_v48 }
 0x1d2   :  { %362 = vadd.xlane.f32.xlu0 %v359_v49 }
 0x23d   :  { %v361_v43 = vpop.xlane.xlu2 %360 }
 0x23e   :  { %v364_v50 = vmul.f32 0.03125, %v361_v43 }
 0x240   :  { %v366_v51 = vadd.f32 1e-05, %v364_v50 }
 0x242   :  { %499 = vrsqrt.f32 %v366_v51  ;;  %vm374_vm1 = vweird.f32 %v366_v51 }
 0x245   :  { %v363_v15 = vpop.xlane.xlu0 %362 }
 0x246   :  { %v365_v52 = vmul.f32 0.03125, %v363_v15 }
 0x248   :  { %v500_v53 = vpop.eup %499  ;;  %v367_v54 = vadd.f32 1e-05, %v365_v52 }
 0x249   :  { %v369_v55 = vmul.f32 %v500_v53, %v366_v51  ;;  %vm375_vm0 = vweird.f32 %v500_v53 }
 0x24a   :  { %501 = vrsqrt.f32 %v367_v54  ;;  %vm376_vm2 = vmor %vm374_vm1, %vm375_vm0  ;;  %vm384_vm4 = vweird.f32 %v367_v54 }
 0x24b   :  { %v370_v56 = vmul.f32 %v500_v53, %v369_v55 }
 0x24d   :  { %v371_v57 = vmul.f32 0.5, %v370_v56 }
 0x24f   :  { %v372_v58 = vsub.f32 1.5, %v371_v57 }
 0x250   :  { %v502_v59 = vpop.eup %501 }
 0x251   :  { %v373_v60 = vmul.f32 %v500_v53, %v372_v58  ;;  %v379_v61 = vmul.f32 %v502_v59, %v367_v54  ;;  %vm385_vm3 = vweird.f32 %v502_v59 }
 0x252   :  { %vm386_vm5 = vmor %vm384_vm4, %vm385_vm3 }
 0x253   :  { %v377_v63 = vsel %vm376_vm2, %v500_v53, %v373_v60  ;;  %v380_v0 = vmul.f32 %v502_v59, %v379_v61 }
 0x254   :  { %v388_v2 = vmul.f32 %v377_v63, %v356_v44 }
 0x255   :  { %v381_v3 = vmul.f32 0.5, %v380_v0 }
 0x256   :  { %v391_v4 = vmul.f32 %v390_v62, %v388_v2 }
 0x257   :  { %v382_v5 = vsub.f32 1.5, %v381_v3 }
 0x258   :  { %v394_v7 = vadd.f32 %v393_v1, %v391_v4 }
 0x259   :  { %v383_v8 = vmul.f32 %v502_v59, %v382_v5 }
 0x25a   :  { %396 = vst [vmem:[#allocation11] sm:$0xff] %v394_v7 }
 0x25b   :  { %v387_v9 = vsel %vm386_vm5, %v502_v59, %v383_v8 }
 0x25c   :  { %v389_v10 = vmul.f32 %v387_v9, %v357_v48 }
 0x25e   :  { %v392_v11 = vmul.f32 %v390_v62, %v389_v10 }
 0x260   :  { %v395_v23 = vadd.f32 %v393_v1, %v392_v11 }
 0x262   :  { %397 = vst [vmem:[#allocation11 + $0x8] sm:$0xff] %v395_v23 }
 0x263   :  { %410 = dma.vmem_to_hbm [thread:$0]  %s403_s21, 256, %s405_s24, [#allocation4], %s663_s25, %s663_s25, %s664_s26  }
 0x264   :  { %653 = dma.done.wait [#allocation4], 256  }
 0x265   :  { %654 = vsyncadd [#allocation4], 4294967040 }
 0x266   :  { %415 = vsyncpa [#allocation3], 1 }
 0x267   :  { %416 = vsyncpa [#allocation6], 1 }
 0x268   :  { %417 = vsyncpa [#allocation9], 1 }
 0x269   :  { %418 = vsyncpa [#allocation4], 1 }

// kernel: tpu_custom_call.1
= control target key start
LH: loop header
LB: loop body
LE: loop exit
PB: predicated region body
PF: predicated region fallthrough
CT: control target
= control target key end

     0   :  { %11 = vsyncpa [#allocation3], 0  ;;  %s751_s0 = inlined_call_operand.hbm [shape: bf16[16,128], index: 0, kind: input, shape index: {}]   ;;  %s752_s1 = inlined_call_operand.hbm [shape: bf16[16,16], index: 1, kind: input, shape index: {}]   ;;  %s753_s2 = inlined_call_operand.hbm [shape: bf16[128,128], index: 2, kind: input, shape index: {}]   ;;  %s754_s3 = inlined_call_operand.hbm [shape: bf16[16,128], index: 3, kind: input, shape index: {}]   ;;  %s755_s4 = inlined_call_operand.hbm [shape: bf16[16,128], index: 4, kind: input, shape index: {}]   ;;  %s756_s5 = inlined_call_operand.vmem [shape: f32[4,128], index: 5, kind: input, shape index: {}]   ;;  %s757_s6 = inlined_call_operand.hbm [shape: f32[16,128], index: 6, kind: output, shape index: {}]  }
   0x1   :  { %12 = vsyncpa [#allocation6], 0 }
   0x2   :  { %13 = vsyncpa [#allocation9], 0 }
   0x3   :  { %14 = vsyncpa [#allocation4], 0  ;;  %s32_s23 = sshll.u32 %s752_s1, 4  ;;  %s655_s24 = smov [#allocation5]   ;;  %s33_s23 = int_to_ptr.hbm [resolvable:$true] %s32_s23 }
   0x4   :  { %s34_s25 = sshll.u32 %s655_s24, 4  ;;  %s58_s28 = sshll.u32 %s754_s3, 4  ;;  %s35_s25 = int_to_ptr.vmem [resolvable:$true] %s34_s25  ;;  %s59_s28 = int_to_ptr.hbm [resolvable:$true] %s58_s28 }
   0x5   :  { %s656_s29 = smov 64   ;;  %s657_s30 = smov 4  }
   0x6   :  { %40 = dma.hbm_to_vmem [thread:$0]  %s33_s23, 128, %s35_s25, [#allocation6], %s656_s29, %s656_s29, %s657_s30  }
   0x7   :  { %s658_s7 = smov [#allocation8]   ;;  %s19_s11 = sshll.u32 %s751_s0, 4  ;;  %s20_s11 = int_to_ptr.hbm [resolvable:$true] %s19_s11 }
   0x8   :  { %s60_s8 = sshll.u32 %s658_s7, 4  ;;  %s45_s13 = sshll.u32 %s753_s2, 4  ;;  %s61_s8 = int_to_ptr.vmem [resolvable:$true] %s60_s8  ;;  %s46_s13 = int_to_ptr.hbm [resolvable:$true] %s45_s13 }
   0x9   :  { %66 = dma.hbm_to_vmem [thread:$0]  %s59_s28, 128, %s61_s8, [#allocation9], %s656_s29, %s656_s29, %s657_s30  }
   0xa   :  { %s659_s14 = smov [#allocation2]   ;;  %s660_s3 = smov [#allocation7]  }
   0xb   :  { %s21_s15 = sshll.u32 %s659_s14, 4  ;;  %s47_s16 = sshll.u32 %s660_s3, 4  ;;  %s22_s15 = int_to_ptr.vmem [resolvable:$true] %s21_s15  ;;  %s48_s16 = int_to_ptr.vmem [resolvable:$true] %s47_s16 }
   0xc   :  { %27 = dma.hbm_to_vmem [thread:$0]  %s20_s11, 128, %s22_s15, [#allocation3], %s656_s29, %s656_s29, %s657_s30  }
   0xd   :  { %s71_s19 = sshll.u32 %s755_s4, 4  ;;  %s661_s0 = smov [#allocation10]   ;;  %s72_s19 = int_to_ptr.hbm [resolvable:$true] %s71_s19 }
   0xe   :  { %53 = dma.hbm_to_vmem [thread:$0]  %s46_s13, 1024, %s48_s16, [#allocation6], %s656_s29, %s656_s29, %s657_s30  }
   0xf   :  { %s73_s20 = sshll.u32 %s661_s0, 4  ;;  %s74_s20 = int_to_ptr.vmem [resolvable:$true] %s73_s20 }
  0x10   :  { %79 = dma.hbm_to_vmem [thread:$0]  %s72_s19, 128, %s74_s20, [#allocation9], %s656_s29, %s656_s29, %s657_s30  }
  0x11   :  { %647 = dma.done.wait [#allocation3], 128  }
  0x12   :  { %648 = vsyncadd [#allocation3], 4294967168 }
  0x13   :  { %649 = dma.done.wait [#allocation6], 1152  }
  0x14   :  { %650 = vsyncadd [#allocation6], 4294966144 }
  0x15   :  { %651 = dma.done.wait [#allocation9], 256  }
  0x16   :  { %652 = vsyncadd [#allocation9], 4294967040  ;;  %v478_v0 = vld [vmem:[#allocation7 + $0x38] sm:$0xff]  ;;  %v480_v1 = vld [vmem:[#allocation10] sm:$0xff]  ;;  %vm140_vm0 = vcmask 130048   ;;  %s404_s24 = sshll.u32 %s757_s6, 4  ;;  %s405_s24 = int_to_ptr.hbm [resolvable:$true] %s404_s24 }
  0x17   :  { %215 = vmatpush.bf16.msra.mxu1 %v478_v0  ;;  %v477_v2 = vld [vmem:[#allocation7 + $0x30] sm:$0xff]  ;;  %v479_v3 = vld [vmem:[#allocation8] sm:$0xff]  ;;  %v470_v4 = vld [vmem:[#allocation5] sm:$0xff]  ;;  %248 = vmatpush.bf16.msra.mxu2 %v480_v1  ;;  %s663_s25 = smov 128   ;;  %s664_s26 = smov 8  }
  0x18   :  { %151 = vmatpush.bf16.msra.mxu0 %v479_v3  ;;  %v103_v5 = vld [vmem:[#allocation2] sm:$0xff]   ;;  %v476_v7 = vld [vmem:[#allocation7 + $0x28] sm:$0xff]  ;;  %v475_v9 = vld [vmem:[#allocation7 + $0x20] sm:$0xff] }
  0x19   :  { %v715_v6 = vunpack.c.l.bf16 %v103_v5  ;;  %v474_v10 = vld [vmem:[#allocation7 + $0x18] sm:$0xff]  ;;  %v473_v11 = vld [vmem:[#allocation7 + $0x10] sm:$0xff]  ;;  %v472_v12 = vld [vmem:[#allocation7 + $0x8] sm:$0xff]  ;;  %v721_v15 = vunpack.c.h.bf16 %v103_v5 }
  0x1a   :  { %468 = vmatmul.msk.bf16.vlgmr.msra.gmra.mxu2 %vm140_vm0, %v470_v4  ;;  %v471_v13 = vld [vmem:[#allocation7] sm:$0xff]  ;;  %v469_v14 = vld [vmem:[#allocation2] sm:$0xff]  ;;  %v105_v17 = vld [vmem:[#allocation5] sm:$0xff]  }
  0x1b   :  { %216 = vmatpush.bf16.msra.mxu1 %v477_v2  ;;  %427 = vmatmul.msk.bf16.vlgmr.msra.gmra.mxu0 %vm140_vm0, %v470_v4  ;;  %v257_v8 = vmul.f32 %v715_v6, %v715_v6  ;;  %v258_v16 = vmul.f32 %v721_v15, %v721_v15  ;;  %v109_v18 = vunpack.c.l.bf16 %v105_v17  ;;  %v110_v20 = vunpack.c.h.bf16 %v105_v17  ;;  %v729_v23 = vld [vmem:[%s756_s5] sm:$0xf]  ;;  %s662_s5 = smov [#allocation11]  }
  0x1c   :  { %v234_v26 = vperm.slane %v729_v23, 1  ;;  %v229_v27 = vperm.slane %v729_v23, 0  ;;  %s402_s21 = sshll.u32 %s662_s5, 4  ;;  %s403_s21 = int_to_ptr.vmem [resolvable:$true] %s402_s21 }
  0x1d   :  { %259 = vadd.xlane.f32.xlu0 %v257_v8  ;;  %v325_v19 = vand.u32 2147483647, %v109_v18  ;;  %v326_v22 = vand.u32 2147483647, %v110_v20 }
  0x1f   :  { %217 = vmatpush.bf16.msra.mxu1 %v476_v7  ;;  %v327_v21 = vsel %vm140_vm0, %v325_v19, -inf  ;;  %v330_v25 = vsel %vm140_vm0, %v326_v22, -inf }
  0x20   :  { %328 = vmax.xlane.f32.xlu2 %v327_v21 }
  0x23   :  { %218 = vmatpush.bf16.msra.mxu1 %v475_v9 }
  0x25   :  { %261 = vadd.xlane.f32.xlu0 %v258_v16 }
  0x27   :  { %219 = vmatpush.bf16.msra.mxu1 %v474_v10 }
  0x28   :  { %331 = vmax.xlane.f32.xlu2 %v330_v25 }
  0x2b   :  { %220 = vmatpush.bf16.msra.mxu1 %v473_v11 }
  0x2f   :  { %221 = vmatpush.bf16.msra.mxu1 %v472_v12 }
  0x33   :  { %222 = vmatpush.bf16.msra.mxu1 %v471_v13 }
  0x36   :  { %223 = vmatmul.bf16.vlgmr.msra.gmra.mxu1 %v469_v14 }
  0x90   :  { %v260_v45 = vpop.xlane.xlu0 %259 }
  0x91   :  { %491 = vrsqrt.f32 %v260_v45  ;;  %vm280_vm3 = vcmp.eq.f32.partialorder %v260_v45, inf  ;;  %v283_v2 = vand.u32 2147483648, %v260_v45  ;;  %vm282_vm4 = vcmp.eq.f32.partialorder %v260_v45, 0.0 }
  0x93   :  { %v329_v13 = vpop.xlane.xlu2 %328 }
  0x94   :  { %vm333_vm11 = vcmp.eq.f32.partialorder %v329_v13, 0.0 }
  0x97   :  { %v492_v47 = vpop.eup %491 }
  0x98   :  { %v153_v24 = vpop.f32.mrf.mxu0  ;;  %v262_v46 = vpop.xlane.xlu0 %261  ;;  %v274_v48 = vmul.f32 %v492_v47, %v260_v45 }
  0x99   :  { %493 = vrsqrt.f32 %v262_v46  ;;  %vm292_vm7 = vcmp.eq.f32.partialorder %v262_v46, inf  ;;  %v295_v18 = vand.u32 2147483648, %v262_v46  ;;  %vm294_vm9 = vcmp.eq.f32.partialorder %v262_v46, 0.0 }
  0x9a   :  { %v275_v49 = vmul.f32 %v492_v47, %v274_v48 }
  0x9c   :  { %v276_v51 = vmul.f32 0.5, %v275_v49 }
  0x9d   :  { %v250_v28 = vpop.f32.mrf.mxu2 }
  0x9e   :  { %v251_v31 = vadd.f32 %v250_v28, %v234_v26  ;;  %v277_v54 = vsub.f32 1.5, %v276_v51 }
  0x9f   :  { %v494_v50 = vpop.eup %493 }
  0xa0   :  { %v155_v35 = vpop.f32.mrf.mxu0  ;;  %v286_v52 = vmul.f32 %v494_v50, %v262_v46  ;;  %v278_v58 = vmul.f32 %v492_v47, %v277_v54 }
  0xa2   :  { %v287_v55 = vmul.f32 %v494_v50, %v286_v52  ;;  %v279_v62 = vmul.f32 %v278_v58, %v260_v45 }
  0xa4   :  { %v288_v57 = vmul.f32 0.5, %v287_v55  ;;  %v281_v3 = vsel %vm280_vm3, %v260_v45, %v279_v62  ;;  %v390_v62 = vperm.slane %v729_v23, 2 }
  0xa5   :  { %v252_v39 = vpop.f32.mrf.mxu2  ;;  %v284_v8 = vsel %vm282_vm4, %v283_v2, %v281_v3 }
  0xa6   :  { %v253_v41 = vadd.f32 %v252_v39, %v234_v26  ;;  %v289_v61 = vsub.f32 1.5, %v288_v57  ;;  %v297_v14 = vmul.f32 0.5, %v284_v8 }
  0xa8   :  { %v290_v4 = vmul.f32 %v494_v50, %v289_v61 }
  0xaa   :  { %v291_v10 = vmul.f32 %v290_v4, %v262_v46 }
  0xac   :  { %v293_v20 = vsel %vm292_vm7, %v262_v46, %v291_v10 }
  0xad   :  { %v296_v25 = vsel %vm294_vm9, %v295_v18, %v293_v20 }
  0xb3   :  { %v224_v29 = vpop.f32.mrf.mxu1 }
  0xb4   :  { %v225_v30 = vadd.f32 %v224_v29, %v153_v24  ;;  %v298_v29 = vmul.f32 0.5, %v296_v25 }
  0xb6   :  { %v230_v32 = vadd.f32 %v229_v27, %v225_v30 }
  0xb8   :  { %v232_v33 = vmax.f32 %v230_v32, 0.0  ;;  %v332_v32 = vpop.xlane.xlu2 %331 }
  0xb9   :  { %vm334_vm14 = vcmp.eq.f32.partialorder %v332_v32, 0.0 }
  0xba   :  { %v734_v34 = vmul.f32 %v251_v31, %v232_v33 }
  0xbb   :  { %v226_v36 = vpop.f32.mrf.mxu1 }
  0xbc   :  { %v227_v37 = vadd.f32 %v226_v36, %v155_v35  ;;  %v263_v38 = vmul.f32 %v734_v34, %v734_v34 }
  0xbe   :  { %v231_v40 = vadd.f32 %v229_v27, %v227_v37  ;;  %265 = vadd.xlane.f32.xlu1 %v263_v38 }
  0xc0   :  { %v233_v42 = vmax.f32 %v231_v40, 0.0 }
  0xc2   :  { %v738_v43 = vmul.f32 %v253_v41, %v233_v42 }
  0xc4   :  { %v264_v44 = vmul.f32 %v738_v43, %v738_v43 }
  0xc6   :  { %267 = vadd.xlane.f32.xlu1 %v264_v44 }
 0x131   :  { %v266_v53 = vpop.xlane.xlu1 %265 }
 0x132   :  { %vm269_vm1 = vcmp.eq.f32.partialorder %v266_v53, 0.0 }
 0x133   :  { %v271_v56 = vsel %vm269_vm1, 1.0, %v266_v53 }
 0x134   :  { %495 = vrsqrt.f32 %v271_v56  ;;  %vm305_vm6 = vweird.f32 %v271_v56 }
 0x139   :  { %v268_v59 = vpop.xlane.xlu1 %267 }
 0x13a   :  { %v496_v60 = vpop.eup %495  ;;  %vm270_vm2 = vcmp.eq.f32.partialorder %v268_v59, 0.0 }
 0x13b   :  { %v300_v63 = vmul.f32 %v496_v60, %v271_v56  ;;  %v272_v0 = vsel %vm270_vm2, 1.0, %v268_v59  ;;  %vm306_vm5 = vweird.f32 %v496_v60 }
 0x13c   :  { %497 = vrsqrt.f32 %v272_v0  ;;  %vm307_vm8 = vmor %vm305_vm6, %vm306_vm5  ;;  %vm315_vm12 = vweird.f32 %v272_v0 }
 0x13d   :  { %v301_v1 = vmul.f32 %v496_v60, %v300_v63 }
 0x13f   :  { %v302_v5 = vmul.f32 0.5, %v301_v1  ;;  %v393_v1 = vperm.slane %v729_v23, 3 }
 0x141   :  { %v303_v7 = vsub.f32 1.5, %v302_v5 }
 0x142   :  { %v498_v9 = vpop.eup %497 }
 0x143   :  { %v304_v11 = vmul.f32 %v496_v60, %v303_v7  ;;  %v310_v12 = vmul.f32 %v498_v9, %v272_v0  ;;  %vm316_vm10 = vweird.f32 %v498_v9 }
 0x144   :  { %vm317_vm13 = vmor %vm315_vm12, %vm316_vm10 }
 0x145   :  { %v311_v16 = vmul.f32 %v498_v9, %v310_v12  ;;  %v308_v17 = vsel %vm307_vm8, %v496_v60, %v304_v11 }
 0x146   :  { %v319_v19 = vmul.f32 %v308_v17, %v297_v14 }
 0x147   :  { %v312_v21 = vmul.f32 0.5, %v311_v16 }
 0x148   :  { %v321_v22 = vmin.f32 %v319_v19, 1.0 }
 0x149   :  { %v313_v24 = vsub.f32 1.5, %v312_v21 }
 0x14a   :  { %v323_v26 = vmul.f32 %v321_v22, %v734_v34  ;;  %v343_v34 = vlaneseq }
 0x14b   :  { %v314_v27 = vmul.f32 %v498_v9, %v313_v24 }
 0x14c   :  { %v339_v28 = vsel %vm333_vm11, 0.0, %v323_v26  ;;  %v344_v39 = vand.u32 127, %v343_v34 }
 0x14d   :  { %v341_v30 = vadd.f32 %v339_v28, %v715_v6  ;;  %v318_v31 = vsel %vm317_vm13, %v498_v9, %v314_v27 }
 0x14e   :  { %v320_v33 = vmul.f32 %v318_v31, %v298_v29  ;;  %vm345_vm15 = vcmp.lt.s32.totalorder %v344_v39, 32 }
 0x14f   :  { %346 = vadd.xlane.f32.xlu0 %v341_v30 }
 0x150   :  { %v322_v35 = vmin.f32 %v320_v33, 1.0 }
 0x152   :  { %v324_v36 = vmul.f32 %v322_v35, %v738_v43 }
 0x154   :  { %v340_v37 = vsel %vm334_vm14, 0.0, %v324_v36 }
 0x155   :  { %v342_v38 = vadd.f32 %v340_v37, %v721_v15 }
 0x157   :  { %348 = vadd.xlane.f32.xlu1 %v342_v38 }
 0x1c2   :  { %v347_v40 = vpop.xlane.xlu0 %346 }
 0x1c3   :  { %v350_v41 = vmul.f32 0.03125, %v347_v40 }
 0x1c5   :  { %v352_v42 = vsub.f32 %v341_v30, %v350_v41 }
 0x1c7   :  { %v356_v44 = vsel %vm345_vm15, %v352_v42, 0.0 }
 0x1c8   :  { %v358_v6 = vmul.f32 %v356_v44, %v356_v44 }
 0x1ca   :  { %v349_v45 = vpop.xlane.xlu1 %348  ;;  %360 = vadd.xlane.f32.xlu2 %v358_v6 }
 0x1cb   :  { %v351_v46 = vmul.f32 0.03125, %v349_v45 }
 0x1cd   :  { %v353_v47 = vsub.f32 %v342_v38, %v351_v46 }
 0x1cf   :  { %v357_v48 = vsel %vm345_vm15, %v353_v47, 0.0 }
 0x1d0   :  { %v359_v49 = vmul.f32 %v357_v48, %v357_v48 }
 0x1d2   :  { %362 = vadd.xlane.f32.xlu0 %v359_v49 }
 0x23d   :  { %v361_v43 = vpop.xlane.xlu2 %360 }
 0x23e   :  { %v364_v50 = vmul.f32 0.03125, %v361_v43 }
 0x240   :  { %v366_v51 = vadd.f32 1e-05, %v364_v50 }
 0x242   :  { %499 = vrsqrt.f32 %v366_v51  ;;  %vm374_vm1 = vweird.f32 %v366_v51 }
 0x245   :  { %v363_v15 = vpop.xlane.xlu0 %362 }
 0x246   :  { %v365_v52 = vmul.f32 0.03125, %v363_v15 }
 0x248   :  { %v500_v53 = vpop.eup %499  ;;  %v367_v54 = vadd.f32 1e-05, %v365_v52 }
 0x249   :  { %v369_v55 = vmul.f32 %v500_v53, %v366_v51  ;;  %vm375_vm0 = vweird.f32 %v500_v53 }
 0x24a   :  { %501 = vrsqrt.f32 %v367_v54  ;;  %vm376_vm2 = vmor %vm374_vm1, %vm375_vm0  ;;  %vm384_vm4 = vweird.f32 %v367_v54 }
 0x24b   :  { %v370_v56 = vmul.f32 %v500_v53, %v369_v55 }
 0x24d   :  { %v371_v57 = vmul.f32 0.5, %v370_v56 }
 0x24f   :  { %v372_v58 = vsub.f32 1.5, %v371_v57 }
 0x250   :  { %v502_v59 = vpop.eup %501 }
 0x251   :  { %v373_v60 = vmul.f32 %v500_v53, %v372_v58  ;;  %v379_v61 = vmul.f32 %v502_v59, %v367_v54  ;;  %vm385_vm3 = vweird.f32 %v502_v59 }
 0x252   :  { %vm386_vm5 = vmor %vm384_vm4, %vm385_vm3 }
 0x253   :  { %v377_v63 = vsel %vm376_vm2, %v500_v53, %v373_v60  ;;  %v380_v0 = vmul.f32 %v502_v59, %v379_v61 }
 0x254   :  { %v388_v2 = vmul.f32 %v377_v63, %v356_v44 }
 0x255   :  { %v381_v3 = vmul.f32 0.5, %v380_v0 }
 0x256   :  { %v391_v4 = vmul.f32 %v390_v62, %v388_v2 }
 0x257   :  { %v382_v5 = vsub.f32 1.5, %v381_v3 }
 0x258   :  { %v394_v7 = vadd.f32 %v393_v1, %v391_v4 }
 0x259   :  { %v383_v8 = vmul.f32 %v502_v59, %v382_v5 }
 0x25a   :  { %396 = vst [vmem:[#allocation11] sm:$0xff] %v394_v7 }
 0x25b   :  { %v387_v9 = vsel %vm386_vm5, %v502_v59, %v383_v8 }
 0x25c   :  { %v389_v10 = vmul.f32 %v387_v9, %v357_v48 }
 0x25e   :  { %v392_v11 = vmul.f32 %v390_v62, %v389_v10 }
 0x260   :  { %v395_v23 = vadd.f32 %v393_v1, %v392_v11 }
 0x262   :  { %397 = vst [vmem:[#allocation11 + $0x8] sm:$0xff] %v395_v23 }
 0x263   :  { %410 = dma.vmem_to_hbm [thread:$0]  %s403_s21, 256, %s405_s24, [#allocation4], %s663_s25, %s663_s25, %s664_s26  }
 0x264   :  { %653 = dma.done.wait [#allocation4], 256  }
 0x265   :  { %654 = vsyncadd [#allocation4], 4294967040 }
 0x266   :  { %415 = vsyncpa [#allocation3], 1 }
 0x267   :  { %416 = vsyncpa [#allocation6], 1 }
 0x268   :  { %417 = vsyncpa [#allocation9], 1 }
 0x269   :  { %418 = vsyncpa [#allocation4], 1 }

</bundles_post_ra>
